<compile_context>
chip_gen: v6e
topology: v6e:2x2x1
jax: 0.10.0
libtpu: 0.0.40
codegen_flags: <defaults>
</compile_context>

<pallas_src>
import jax
import jax.numpy as jnp
import numpy as np
from jax import lax
from jax.experimental import pallas as pl
from jax.experimental.pallas import tpu as pltpu


def _round_up(v, m):
    return (v + m - 1) // m * m


def _choose_p_tile(ck_pad, cout, p, budget_bytes=8 * 1024 * 1024, tp_max=2048):
    """Pick the output-voxel tile: multiple of 128, double-buffered tiles within budget."""
    per_row = 2 * (ck_pad * 2 + cout * 4)       # bf16 patch row + f32 out row, x2 buffers
    tp = max(128, min(tp_max, (budget_bytes // per_row) // 128 * 128))
    return int(min(tp, _round_up(p, 128)))


def _dyn_conv3d_kernel(attn_ref, patches_ref, w_ref, bias_ref, o_ref,
                       agg_w_ref, agg_b_ref):
    b = pl.program_id(0)
    pj = pl.program_id(1)
    num_experts = w_ref.shape[0]

    # ---- aggregate the K expert kernels / biases once per batch element ----
    @pl.when(pj == 0)
    def _():
        a0 = attn_ref[b, 0]                                   # f32 scalar from SMEM
        w_acc = a0 * w_ref[0].astype(jnp.float32)             # (Cout, CKp)
        b_acc = a0 * bias_ref[:, 0:1]                         # (Cout, 1)
        for kk in range(1, num_experts):                      # K is tiny -> unrolled
            ak = attn_ref[b, kk]
            w_acc = w_acc + ak * w_ref[kk].astype(jnp.float32)
            b_acc = b_acc + ak * bias_ref[:, kk:kk + 1]
        agg_w_ref[...] = w_acc.astype(agg_w_ref.dtype)         # store bf16 for the MXU
        agg_b_ref[...] = b_acc

    # ---- conv3d as im2col matmul (MXU hot path, lane-dense (Cout, TP) output) ----
    out = lax.dot_general(agg_w_ref[...], patches_ref[0],
                          (((1,), (0,)), ((), ())),
                          preferred_element_type=jnp.float32)  # (Cout, TP) f32
    o_ref[0] = (out + agg_b_ref[...]).astype(o_ref.dtype)


def _im2col_3d(x, k, stride, padding, dilation):
    """x: (B, C, D, H, W) -> (patches (B, C*k^3, OD*OH*OW), (OD, OH, OW)).

    Flattening order of axis 1 is (c, kd, kh, kw), matching the conv weight layout
    (Cout, Cin, kd, kh, kw) flattened over its last four dims.
    """
    B, C, D, H, W = x.shape
    if padding:
        pad = ((0, 0), (0, 0), (padding, padding), (padding, padding),
               (padding, padding))
        x = jnp.pad(x, pad)
    eff = dilation * (k - 1) + 1
    OD = (D + 2 * padding - eff) // stride + 1
    OH = (H + 2 * padding - eff) // stride + 1
    OW = (W + 2 * padding - eff) // stride + 1
    slices = []
    for kd in range(k):
        for kh in range(k):
            for kw in range(k):
                d0 = kd * dilation
                h0 = kh * dilation
                w0 = kw * dilation
                sl = x[:, :,
                       d0:d0 + (OD - 1) * stride + 1:stride,
                       h0:h0 + (OH - 1) * stride + 1:stride,
                       w0:w0 + (OW - 1) * stride + 1:stride]
                slices.append(sl)                              # (B, C, OD, OH, OW)
    pt = jnp.stack(slices, axis=2)                             # (B, C, k^3, OD, OH, OW)
    pt = pt.reshape(B, C * k ** 3, OD * OH * OW)               # (B, CK, P)
    return pt, (OD, OH, OW)


def dynamic_conv3d(x, weight, bias, fc1_w, fc2_w, *, kernel_size, stride=1,
                   padding=0, dilation=1, K=4, temperature=34):
    assert temperature % 3 == 1
    B, C, D, H, W = x.shape
    k = kernel_size
    Cout = weight.shape[1]
    CK = C * k ** 3

    xf = x.astype(jnp.float32)

    # ---- attention3d (tiny (B, K) computation) stays in plain JAX / f32 ----
    pooled = xf.mean(axis=(2, 3, 4))                                    # (B, Cin)
    h = jax.nn.relu(pooled @ fc1_w.astype(jnp.float32).T)               # (B, hidden)
    logits = h @ fc2_w.astype(jnp.float32).T                            # (B, K)
    attn = jax.nn.softmax(logits / float(temperature), axis=-1)         # (B, K) f32

    # ---- im2col patches, padded to (8,128)-friendly shapes, cast to bf16 ----
    patches, (OD, OH, OW) = _im2col_3d(xf, k, stride, padding, dilation)  # (B, CK, P)
    P = OD * OH * OW
    CK_pad = _round_up(CK, 128)
    TP = _choose_p_tile(CK_pad, Cout, P)
    P_pad = _round_up(P, TP)
    NP = P_pad // TP

    patches = jnp.pad(patches, ((0, 0), (0, CK_pad - CK), (0, P_pad - P)))
    patches = patches.astype(jnp.bfloat16)                               # (B, CKp, Pp)

    w_flat = weight.reshape(K, Cout, CK).astype(jnp.float32)
    w_flat = jnp.pad(w_flat, ((0, 0), (0, 0), (0, CK_pad - CK)))
    w_flat = w_flat.astype(jnp.bfloat16)                                 # (K, Cout, CKp)

    bias_t = bias.astype(jnp.float32).T                                  # (Cout, K)

    vmem_need = (K * Cout * CK_pad * 2            # resident expert weights (bf16)
                 + 2 * CK_pad * TP * 2            # double-buffered patch tiles
                 + 2 * Cout * TP * 4              # double-buffered output tiles
                 + Cout * CK_pad * 2              # agg_w scratch
                 + Cout * 4 + Cout * K * 4)       # agg_b scratch + bias
    vmem_limit = int(min(max(2 * vmem_need, 16 * 1024 * 1024), 48 * 1024 * 1024))

    out = pl.pallas_call(
        _dyn_conv3d_kernel,
        out_shape=jax.ShapeDtypeStruct((B, Cout, P_pad), jnp.float32),
        grid_spec=pltpu.PrefetchScalarGridSpec(
            num_scalar_prefetch=0,
            grid=(B, NP),
            in_specs=[
                pl.BlockSpec(memory_space=pltpu.MemorySpace.SMEM),           # attn (B,K)
                pl.BlockSpec((1, CK_pad, TP), lambda b, pj: (b, 0, pj)),     # patches
                pl.BlockSpec((K, Cout, CK_pad), lambda b, pj: (0, 0, 0)),    # experts
                pl.BlockSpec((Cout, K), lambda b, pj: (0, 0)),               # bias^T
            ],
            out_specs=pl.BlockSpec((1, Cout, TP), lambda b, pj: (b, 0, pj)),
            scratch_shapes=[
                pltpu.VMEM((Cout, CK_pad), jnp.bfloat16),   # aggregated conv kernel
                pltpu.VMEM((Cout, 1), jnp.float32),         # aggregated bias
            ],
        ),
        compiler_params=pltpu.CompilerParams(
            dimension_semantics=("parallel", "arbitrary"),
            vmem_limit_bytes=vmem_limit),
    )(attn, patches, w_flat, bias_t)

    # (B, Cout, P_pad) -> (B, Cout, OD, OH, OW)  (NCDHW, no transpose needed)
    return out[:, :, :P].reshape(B, Cout, OD, OH, OW)


def reference_forward(x, weight, bias, fc1_w, fc2_w, *, stride, padding,
                      dilation, temperature):
    """Pure-JAX (f32) reference matching the PyTorch forward pass."""
    B, C, D, H, W = x.shape
    K, Cout, _, k, _, _ = weight.shape
    pooled = x.mean(axis=(2, 3, 4))                                # (B, C)
    h = jax.nn.relu(pooled @ fc1_w.T)                              # (B, hidden)
    logits = h @ fc2_w.T                                           # (B, K)
    attn = jax.nn.softmax(logits / temperature, axis=1)            # (B, K)
    agg_w = (attn @ weight.reshape(K, -1)).reshape(B * Cout, C, k, k, k)
    agg_b = (attn @ bias).reshape(-1)                              # (B*Cout,)
    xg = x.reshape(1, B * C, D, H, W)
    out = lax.conv_general_dilated(
        xg, agg_w,
        window_strides=(stride,) * 3,
        padding=[(padding, padding)] * 3,
        rhs_dilation=(dilation,) * 3,
        feature_group_count=B,
        dimension_numbers=("NCDHW", "OIDHW", "NCDHW"))
    out = out + agg_b[None, :, None, None, None]
    _, _, OD, OH, OW = out.shape
    return out.reshape(B, Cout, OD, OH, OW)


if __name__ == "__main__":
    B, Cin, Cout = 2, 4, 8
    D = H = W = 8
    k = 3
    K = 4
    ratio = 0.25
    temperature = 34                       # temperature % 3 == 1
    hidden = int(Cin * ratio) + 1          # in_planes != 3 branch -> 2

    key = jax.random.PRNGKey(0)
    kx, kw, kb, k1, k2 = jax.random.split(key, 5)
    x = jax.random.normal(kx, (B, Cin, D, H, W), jnp.float32)
    weight = jax.random.normal(kw, (K, Cout, Cin, k, k, k), jnp.float32)
    bias = 0.1 * jax.random.normal(kb, (K, Cout), jnp.float32)
    fc1_w = 0.5 * jax.random.normal(k1, (hidden, Cin), jnp.float32)
    fc2_w = 0.5 * jax.random.normal(k2, (K, hidden), jnp.float32)

    out = dynamic_conv3d(x, weight, bias, fc1_w, fc2_w,
                         kernel_size=k, stride=1, padding=0, dilation=1,
                         K=K, temperature=temperature)
    out = jax.block_until_ready(out)

    ref = reference_forward(x, weight, bias, fc1_w, fc2_w,
                            stride=1, padding=0, dilation=1,
                            temperature=temperature)
    # patches / expert weights travel in bf16 (f32 accumulation), so tolerance is
    # loosened relative to the previous all-f32 version.
    np.testing.assert_allclose(np.asarray(out), np.asarray(ref),
                               rtol=5e-2, atol=1e-1)
    print("KERNEL_OK")
</pallas_src>

<mosaic_0001>
module attributes {stable_mosaic.version = 11 : i64} {
  func.func @_dyn_conv3d_kernel(%arg0: i32, %arg1: i32, %arg2: memref<2x4xf32, #tpu.memory_space<smem>>, %arg3: memref<1x128x256xbf16, #tpu.memory_space<vmem>>, %arg4: memref<4x8x128xbf16, #tpu.memory_space<vmem>>, %arg5: memref<8x4xf32, #tpu.memory_space<vmem>>, %arg6: memref<1x8x256xf32, #tpu.memory_space<vmem>>, %arg7: memref<8x128xbf16, #tpu.memory_space<vmem>>, %arg8: memref<8x1xf32, #tpu.memory_space<vmem>>) attributes {dimension_semantics = [#tpu.dimension_semantics<parallel>, #tpu.dimension_semantics<arbitrary>], iteration_bounds = array<i64: 2, 1>, scalar_prefetch = 0 : i64, scratch_operands = 2 : i64, tpu.core_type = #tpu.core_type<tc>, window_params = [{transform_indices = @transform_0, window_bounds = array<i64: 2, 4>}, {transform_indices = @transform_1, window_bounds = array<i64: 1, 128, 256>}, {pipeline_mode = #tpu.pipeline_mode<synchronous>, transform_indices = @transform_2, window_bounds = array<i64: 4, 8, 128>}, {pipeline_mode = #tpu.pipeline_mode<synchronous>, transform_indices = @transform_3, window_bounds = array<i64: 8, 4>}, {transform_indices = @transform_4, window_bounds = array<i64: 1, 8, 256>}]} {
    %c0_i32 = arith.constant 0 : i32
    %0 = arith.cmpi eq, %arg1, %c0_i32 : i32
    %1 = arith.extui %0 : i1 to i32
    %c0_i32_0 = arith.constant 0 : i32
    %2 = arith.cmpi ne, %1, %c0_i32_0 : i32
    scf.if %2 {
      %13 = arith.index_cast %arg0 : i32 to index
      %c0_10 = arith.constant 0 : index
      %14 = memref.load %arg2[%13, %c0_10] : memref<2x4xf32, #tpu.memory_space<smem>>
      %c0_11 = arith.constant 0 : index
      %c0_12 = arith.constant 0 : index
      %c0_13 = arith.constant 0 : index
      %15 = vector.load %arg4[%c0_11, %c0_12, %c0_13] : memref<4x8x128xbf16, #tpu.memory_space<vmem>>, vector<1x8x128xbf16>
      %16 = vector.shape_cast %15 : vector<1x8x128xbf16> to vector<8x128xbf16>
      %17 = arith.extf %16 : vector<8x128xbf16> to vector<8x128xf32>
      %18 = vector.broadcast %14 : f32 to vector<8x128xf32>
      %19 = arith.mulf %18, %17 : vector<8x128xf32>
      %c0_14 = arith.constant 0 : index
      %c0_15 = arith.constant 0 : index
      %20 = vector.load %arg5[%c0_14, %c0_15] : memref<8x4xf32, #tpu.memory_space<vmem>>, vector<8x1xf32>
      %21 = vector.broadcast %14 : f32 to vector<8x1xf32>
      %22 = arith.mulf %21, %20 : vector<8x1xf32>
      %23 = arith.index_cast %arg0 : i32 to index
      %c1 = arith.constant 1 : index
      %24 = memref.load %arg2[%23, %c1] : memref<2x4xf32, #tpu.memory_space<smem>>
      %c1_16 = arith.constant 1 : index
      %c0_17 = arith.constant 0 : index
      %c0_18 = arith.constant 0 : index
      %25 = vector.load %arg4[%c1_16, %c0_17, %c0_18] : memref<4x8x128xbf16, #tpu.memory_space<vmem>>, vector<1x8x128xbf16>
      %26 = vector.shape_cast %25 : vector<1x8x128xbf16> to vector<8x128xbf16>
      %27 = arith.extf %26 : vector<8x128xbf16> to vector<8x128xf32>
      %28 = vector.broadcast %24 : f32 to vector<8x128xf32>
      %29 = arith.mulf %28, %27 : vector<8x128xf32>
      %30 = arith.addf %19, %29 : vector<8x128xf32>
      %c0_19 = arith.constant 0 : index
      %c1_20 = arith.constant 1 : index
      %31 = vector.load %arg5[%c0_19, %c1_20] : memref<8x4xf32, #tpu.memory_space<vmem>>, vector<8x1xf32>
      %32 = vector.broadcast %24 : f32 to vector<8x1xf32>
      %33 = arith.mulf %32, %31 : vector<8x1xf32>
      %34 = arith.addf %22, %33 : vector<8x1xf32>
      %35 = arith.index_cast %arg0 : i32 to index
      %c2 = arith.constant 2 : index
      %36 = memref.load %arg2[%35, %c2] : memref<2x4xf32, #tpu.memory_space<smem>>
      %c2_21 = arith.constant 2 : index
      %c0_22 = arith.constant 0 : index
      %c0_23 = arith.constant 0 : index
      %37 = vector.load %arg4[%c2_21, %c0_22, %c0_23] : memref<4x8x128xbf16, #tpu.memory_space<vmem>>, vector<1x8x128xbf16>
      %38 = vector.shape_cast %37 : vector<1x8x128xbf16> to vector<8x128xbf16>
      %39 = arith.extf %38 : vector<8x128xbf16> to vector<8x128xf32>
      %40 = vector.broadcast %36 : f32 to vector<8x128xf32>
      %41 = arith.mulf %40, %39 : vector<8x128xf32>
      %42 = arith.addf %30, %41 : vector<8x128xf32>
      %c0_24 = arith.constant 0 : index
      %c2_25 = arith.constant 2 : index
      %43 = vector.load %arg5[%c0_24, %c2_25] : memref<8x4xf32, #tpu.memory_space<vmem>>, vector<8x1xf32>
      %44 = vector.broadcast %36 : f32 to vector<8x1xf32>
      %45 = arith.mulf %44, %43 : vector<8x1xf32>
      %46 = arith.addf %34, %45 : vector<8x1xf32>
      %47 = arith.index_cast %arg0 : i32 to index
      %c3 = arith.constant 3 : index
      %48 = memref.load %arg2[%47, %c3] : memref<2x4xf32, #tpu.memory_space<smem>>
      %c3_26 = arith.constant 3 : index
      %c0_27 = arith.constant 0 : index
      %c0_28 = arith.constant 0 : index
      %49 = vector.load %arg4[%c3_26, %c0_27, %c0_28] : memref<4x8x128xbf16, #tpu.memory_space<vmem>>, vector<1x8x128xbf16>
      %50 = vector.shape_cast %49 : vector<1x8x128xbf16> to vector<8x128xbf16>
      %51 = arith.extf %50 : vector<8x128xbf16> to vector<8x128xf32>
      %52 = vector.broadcast %48 : f32 to vector<8x128xf32>
      %53 = arith.mulf %52, %51 : vector<8x128xf32>
      %54 = arith.addf %42, %53 : vector<8x128xf32>
      %c0_29 = arith.constant 0 : index
      %c3_30 = arith.constant 3 : index
      %55 = vector.load %arg5[%c0_29, %c3_30] : memref<8x4xf32, #tpu.memory_space<vmem>>, vector<8x1xf32>
      %56 = vector.broadcast %48 : f32 to vector<8x1xf32>
      %57 = arith.mulf %56, %55 : vector<8x1xf32>
      %58 = arith.addf %46, %57 : vector<8x1xf32>
      %59 = arith.truncf %54 : vector<8x128xf32> to vector<8x128xbf16>
      %c0_31 = arith.constant 0 : index
      %c0_32 = arith.constant 0 : index
      %60 = vector.load %arg7[%c0_31, %c0_32] : memref<8x128xbf16, #tpu.memory_space<vmem>>, vector<8x128xbf16>
      tpu.vector_store %arg7[%c0_31, %c0_32], %59 {strides = array<i32>} : memref<8x128xbf16, #tpu.memory_space<vmem>>, vector<8x128xbf16>,
      %c0_33 = arith.constant 0 : index
      %c0_34 = arith.constant 0 : index
      %61 = vector.load %arg8[%c0_33, %c0_34] : memref<8x1xf32, #tpu.memory_space<vmem>>, vector<8x1xf32>
      tpu.vector_store %arg8[%c0_33, %c0_34], %58 {strides = array<i32>} : memref<8x1xf32, #tpu.memory_space<vmem>>, vector<8x1xf32>,
    } else {
    }
    %c0 = arith.constant 0 : index
    %c0_1 = arith.constant 0 : index
    %3 = vector.load %arg7[%c0, %c0_1] : memref<8x128xbf16, #tpu.memory_space<vmem>>, vector<8x128xbf16>
    %c0_2 = arith.constant 0 : index
    %c0_3 = arith.constant 0 : index
    %c0_4 = arith.constant 0 : index
    %4 = vector.load %arg3[%c0_2, %c0_3, %c0_4] : memref<1x128x256xbf16, #tpu.memory_space<vmem>>, vector<1x128x256xbf16>
    %5 = vector.shape_cast %4 : vector<1x128x256xbf16> to vector<128x256xbf16>
    %cst = arith.constant dense<0.000000e+00> : vector<8x256xf32>
    %6 = tpu.matmul %3, %5, %cst {dimension_numbers = #tpu.dot_dimension_numbers<[1], [0], [0], [1], [0, 0, 1, 1], [], []>} : vector<8x128xbf16>, vector<128x256xbf16>, vector<8x256xf32> -> vector<8x256xf32>
    %c0_5 = arith.constant 0 : index
    %c0_6 = arith.constant 0 : index
    %7 = vector.load %arg8[%c0_5, %c0_6] : memref<8x1xf32, #tpu.memory_space<vmem>>, vector<8x1xf32>
    %8 = vector.broadcast %7 : vector<8x1xf32> to vector<8x256xf32>
    %9 = arith.addf %6, %8 : vector<8x256xf32>
    %c0_7 = arith.constant 0 : index
    %c0_8 = arith.constant 0 : index
    %c0_9 = arith.constant 0 : index
    %10 = vector.load %arg6[%c0_7, %c0_8, %c0_9] : memref<1x8x256xf32, #tpu.memory_space<vmem>>, vector<1x8x256xf32>
    %11 = vector.shape_cast %10 : vector<1x8x256xf32> to vector<8x256xf32>
    %12 = vector.shape_cast %9 : vector<8x256xf32> to vector<1x8x256xf32>
    tpu.vector_store %arg6[%c0_7, %c0_8, %c0_9], %12 {strides = array<i32>} : memref<1x8x256xf32, #tpu.memory_space<vmem>>, vector<1x8x256xf32>,
    return
  }
  func.func @transform_0(%arg0: i32, %arg1: i32) -> (i32, i32) {
    %c0_i32 = arith.constant 0 : i32
    %c0_i32_0 = arith.constant 0 : i32
    %c0_i32_1 = arith.constant 0 : i32
    return %c0_i32, %c0_i32_0 : i32, i32
  }
  func.func @transform_1(%arg0: i32, %arg1: i32) -> (i32, i32, i32) {
    %c0_i32 = arith.constant 0 : i32
    %c0_i32_0 = arith.constant 0 : i32
    return %arg0, %c0_i32, %arg1 : i32, i32, i32
  }
  func.func @transform_2(%arg0: i32, %arg1: i32) -> (i32, i32, i32) {
    %c0_i32 = arith.constant 0 : i32
    %c0_i32_0 = arith.constant 0 : i32
    %c0_i32_1 = arith.constant 0 : i32
    %c0_i32_2 = arith.constant 0 : i32
    return %c0_i32, %c0_i32_0, %c0_i32_1 : i32, i32, i32
  }
  func.func @transform_3(%arg0: i32, %arg1: i32) -> (i32, i32) {
    %c0_i32 = arith.constant 0 : i32
    %c0_i32_0 = arith.constant 0 : i32
    %c0_i32_1 = arith.constant 0 : i32
    return %c0_i32, %c0_i32_0 : i32, i32
  }
  func.func @transform_4(%arg0: i32, %arg1: i32) -> (i32, i32, i32) {
    %c0_i32 = arith.constant 0 : i32
    %c0_i32_0 = arith.constant 0 : i32
    return %arg0, %c0_i32, %arg1 : i32, i32, i32
  }
}

</mosaic_0001>

<bundles_post_ra>
// kernel: tpu_custom_call.1
= control target key start
LH: loop header
LB: loop body
LE: loop exit
PB: predicated region body
PF: predicated region fallthrough
CT: control target
= control target key end

     0   :  { %s1151_s0 = inlined_call_operand.vmem [shape: f32[2,4], index: 0, kind: input, shape index: {}]   ;;  %s1152_s1 = inlined_call_operand.hbm [shape: bf16[2,128,256], index: 1, kind: input, shape index: {}]   ;;  %s1153_s2 = inlined_call_operand.hbm [shape: bf16[4,8,128], index: 2, kind: input, shape index: {}]   ;;  %s1154_s3 = inlined_call_operand.vmem [shape: f32[8,4], index: 3, kind: input, shape index: {}]   ;;  %s1155_s4 = inlined_call_operand.hbm [shape: f32[2,8,256], index: 4, kind: output, shape index: {}]  }
   0x1   :  { %1164 = sst [smem:[#allocation17_spill]] %s1151_s0 }
   0x2   :  { %9 = vsyncpa [#allocation7], 0 }
   0x3   :  { %10 = vsyncpa [#allocation5], 0 }
   0x4   :  { %12 = vsyncpa [#allocation5 + $0x1], 0 }
   0x5   :  { %13 = vsyncpa [#allocation10], 0 }
   0x6   :  { %14 = vsyncpa [#allocation6], 0 }
   0x7   :  { %16 = vsyncpa [#allocation6 + $0x1], 0  ;;  %s944_s15 = smov 0   ;;  %s946_s16 = smov 0  }
   0x8   :  { %s948_s17 = smov 0   ;;  %s950_s18 = smov 0  }
   0x9   :  { %s952_s19 = smov 0   ;;  %s954_s20 = smov 0  }
   0xa LB: > { %1165 = sst [smem:[#allocation16_spill]] %s905_s20  ;;  %s593_s21 = sadd.s32 4294967295, %s905_s20   ;;  %s905_s20 = sphi %s954_s20, %s22_s20   ;;  %s901_s19 = sphi %s952_s19, %s1189_s19   ;;  %s897_s18 = sphi %s950_s18, %s1188_s18   ;;  %s893_s17 = sphi %s948_s17, %s1187_s17   ;;  %s889_s16 = sphi %s946_s16, %s1186_s16   ;;  %s885_s15 = sphi %s944_s15, %s1185_s15  }
   0xb   : > { %s594_s22 = sadd.s32 4294967294, %s905_s20   ;;  %p71_p0 = scmp.ne.s32.totalorder %s893_s17, %s889_s16 }
   0xc   : > { %p72_p1 = scmp.eq.s32.totalorder %s905_s20, 0  ;;  %p77_p2 = scmp.ne.s32.totalorder %s889_s16, %s885_s15 }
   0xd   : > { %p982_p3 = scmp.eq.s32.totalorder %s593_s21, 0  ;;  %p145_p4 = scmp.eq.s32.totalorder %s593_s21, 1 }
   0xe   : > { %p986_p5 = por %p72_p1, %p71_p0  ;;  %p151_p6 = scmp.eq.s32.totalorder %s594_s22, 1 }
   0xf   : > { %s1166_s24 = scalar_select %p982_p3, 1, 0 }
  0x10   : > { %p992_p7 = por %p982_p3, %p77_p2  ;;  %p996_p8 = por %p145_p4, %p71_p0 }
  0x11   : > { %p1000_p9 = por %p151_p6, %p77_p2  ;;  %p595_p10 = scmp.ge.s32.totalorder %s905_s20, 1 }
  0x12   : > { %s1168_s26 = scalar_select %p992_p7, 1, 0 }
  0x13   : > { %s1169_s27 = scalar_select %p996_p8, 1, 0 }
  0x14   : > { %s1170_s28 = scalar_select %p1000_p9, 1, 0 }
  0x15   : > { %p158_p11 = scmp.lt.s32.totalorder %s905_s20, 3  ;;  %s1171_s0 = sld [smem:[#allocation17_spill]] }
  0x16   : > { %p660_p0 = scmp.lt.s32.totalorder %s905_s20, 2  ;;  %s907_s8 = smov [#allocation9]  }
  0x17   : > { %p1009_p12 = pnand %p595_p10, %p158_p11  ;;  %s181_s9 = sshll.u32 %s907_s8, 4  ;;  %s182_s9 = int_to_ptr.vmem [resolvable:$true] %s181_s9 }
  0x18   : > { %p1019_p2 = pnand %p660_p0, %p986_p5 }
  0x19   : > { %s1172_s6 = scalar_select %p1009_p12, 1, 0 }
  0x1a   : > { %p643_p1 = pneg %p1009_p12 }
  0x1b   : > { %s171_s5 = sshll.u32 %s1171_s0, 4  ;;  %s172_s5 = int_to_ptr.vmem [resolvable:$true] %s171_s5 }
  0x1c   : > { %s1173_s7 = scalar_select %p1019_p2, 1, 0 }
  0x1d   : > { %p1025_p4 = pnand %p643_p1, %p982_p3  ;;  %s748_s11 = scalar_lea.vmem %s172_s5, 32 }
  0x1e   : > { %p749_p6 = scmp.ne.s32.totalorder %s172_s5, %s748_s11  ;;  %p756_p9 = scmp.lt.s32.totalorder %s172_s5, %s172_s5 }
  0x1f   : > { %p750_p10 = pneg %p1025_p4  ;;  %p757_p5 = scmp.lt.s32.totalorder %s748_s11, %s748_s11 }
  0x21   : > { %p751_p11 = pnand %p750_p10, %p749_p6  ;;  %p758_p0 = por %p757_p5, %p756_p9 }
  0x23   : > { %p752_p13 = pneg %p751_p11 }
  0x25   : > { %p759_p8 = pnand %p758_p0, %p752_p13 }
  0x27   : > { %762 = shalt.err (!%p759_p8)
}
  0x28   : > { %s908_s12 = smov [#allocation4]   ;;  %s774_s13 = scalar_lea.vmem %s182_s9, 256 }
  0x29   : > { %646 = dma.vmem_to_smem (!%p1025_p4), %s172_s5, 32, %s908_s12, [#allocation7]  }
  0x2a   : > { %p775_p1 = scmp.ne.s32.totalorder %s182_s9, %s774_s13  ;;  %p782_p12 = scmp.lt.s32.totalorder %s182_s9, %s182_s9 }
  0x2b   : > { %p783_p2 = scmp.lt.s32.totalorder %s774_s13, %s774_s13 }
  0x2c   : > { %p777_p7 = pnand %p775_p1, %p750_p10 }
  0x2d   : > { %p784_p6 = por %p783_p2, %p782_p12 }
  0x2e   : > { %p778_p3 = pneg %p777_p7 }
  0x30   : > { %p785_p11 = pnand %p784_p6, %p778_p3 }
  0x32   : > { %788 = shalt.err (!%p785_p11)
}
  0x33   : > { %s909_s14 = smov 64   ;;  %s910_s21 = smov 4  }
  0x34   : > { %649 = dma.hbm_to_vmem [thread:$0]  (!%p1025_p4), %s1153_s2, 256, %s182_s9, [#allocation10], %s909_s14, %s909_s14, %s910_s21  }
  0x35   : > { %s198_s29 = sand.u32 1, %s893_s17   ;;  %s34_s30 = sadd.s32 1, %s901_s19 }
  0x36   : > { %s599_s5 = sshll.u32 %s198_s29, 7  ;;  %p36_p7 = scmp.ge.s32.totalorder %s34_s30, 2 }
  0x37   : > { %s629_s8 = sshll.u32 %s901_s19, 11  ;;  %s202_s11 = scalar_lea.vmem [#allocation8], %s599_s5 }
  0x38   : > { %s211_s12 = sshll.u32 %s202_s11, 4  ;;  %s1191_s30 = smov (%p36_p7, %s34_s30), 0  ;;  %s212_s12 = int_to_ptr.vmem [resolvable:$true] %s211_s12 }
  0x39   : > { %s210_s0 = scalar_lea.hbm %s1152_s1, %s629_s8  ;;  %s59_s10 = ssub.s32 %s901_s19, %s1191_s30 }
  0x3a   : > { %p1048_p3 = scmp.eq.s32.totalorder %s59_s10, 0  ;;  %s199_s9 = scalar_lea.sflag [#allocation5], %s198_s29 }
  0x3b   : > { %p1176_p8 = scmp.ne.s32.totalorder %s1173_s7, 0  ;;  %s802_s14 = scalar_lea.vmem %s212_s12, 2048 }
  0x3c   : > { %p803_p12 = scmp.ne.s32.totalorder %s212_s12, %s802_s14  ;;  %s911_s21 = smov [#allocation8]  }
  0x3d   : > { %p791_p9 = pneg %p1176_p8  ;;  %s807_s22 = sshll.u32 %s911_s21, 4  ;;  %s808_s22 = int_to_ptr.vmem [resolvable:$false] %s807_s22 }
  0x3e   : > { %s809_s25 = scalar_lea.vmem %s808_s22, 4096  ;;  %p810_p4 = scmp.lt.s32.totalorder %s212_s12, %s808_s22 }
  0x3f   : > { %p805_p13 = pnand %p803_p12, %p791_p9  ;;  %p811_p10 = scmp.lt.s32.totalorder %s809_s25, %s802_s14 }
  0x41   : > { %p806_p2 = pneg %p805_p13  ;;  %p812_p5 = por %p811_p10, %p810_p4 }
  0x43   : > { %p813_p0 = pnand %p812_p5, %p806_p2 }
  0x45   : > { %816 = shalt.err (!%p813_p0)
}
  0x46   : > { %s912_s23 = smov 128   ;;  %s913_s29 = smov 8  }
  0x47   : > { %653 = dma.hbm_to_vmem [thread:$0]  (!%p1176_p8), %s210_s0, 2048, %s212_s12, %s199_s9, %s912_s23, %s912_s23, %s913_s29  }
  0x48   : > { %s1177_s5 = sadd.s32 1, %s893_s17  ;;  %p1178_p1 = scmp.ne.s32.totalorder %s1172_s6, 0 }
  0x49   : > { %s1061_s8 = scalar_select %p1048_p3, %s893_s17, %s1177_s5  }
  0x4a   : > { %223 = sbr.rel (%p1178_p1) target bundleno = 369 (0x171), region = 36  ;;  %p1179_p6 = scmp.ne.s32.totalorder (!%p1178_p1), %s1166_s24, 0 }
  0x4f   : > { %868 = dma.done.wait (%p1179_p6), [#allocation7], 32  }
  0x50   : > { %870 = vsyncadd (%p1179_p6), [#allocation7], 4294967264  ;;  %s1070_s11 = sand.u32 1, %s889_s16   ;;  %p1180_p11 = scmp.ne.s32.totalorder %s1168_s26, 0 }
  0x51   : > { %s604_s0 = sshll.u32 %s1070_s11, 7  ;;  %s230_s7 = scalar_lea.sflag [#allocation5], %s1070_s11 }
  0x52   : > { %s1074_s20 = scalar_lea.vmem [#allocation8], %s604_s0 }
  0x53   : > { %872 = dma.done.wait (%p1180_p11), %s230_s7, 2048  }
  0x54   : > { %874 = vsyncadd (%p1180_p11), %s230_s7, 4294965248 }
  0x55   : > { %876 = dma.done.wait (%p1179_p6), [#allocation10], 256  }
  0x56   : > { %878 = vsyncadd (%p1179_p6), [#allocation10], 4294967040 }
  0x57   : > { %242 = sfence }
  0x58   : > { %s607_s6 = sshll.u32 %s897_s18, 7  ;;  %v272_v0 = vld [vmem:[#allocation9] sm:$0xff]   ;;  %v724_v1 = vld [vmem:[%s1074_s20 + $0x74] ss:$8 sps:$4 sm:$0xff]   ;;  %v914_v2 = vmov 0   ;;  %v295_v4 = vld [vmem:[#allocation9 + $0x8] sm:$0xff]  }
  0x59   : > { %s278_s12 = sadd.s32 1, %s607_s6  ;;  %s271_s13 = sld [smem:[#allocation4 + %s607_s6]]  ;;  %459 = vmatprep.mubr.bf16.mxu0 %v914_v2  ;;  %722 = vset.pattern.permute.xlu1 %v914_v2  ;;  %v726_v3 = vld [vmem:[%s1074_s20 + $0x70] ss:$8 sps:$4 sm:$0xff]   ;;  %v727_v5 = vld [vmem:[%s1074_s20 + $0x64] ss:$8 sps:$4 sm:$0xff]   ;;  %v273_v6 = vunpack.c.l.bf16 %v272_v0  ;;  %v282_v8 = vunpack.c.h.bf16 %v272_v0  ;;  %v296_v11 = vunpack.c.l.bf16 %v295_v4  ;;  %v310_v15 = vunpack.c.h.bf16 %v295_v4 }
  0x5a   : > { %s279_s26 = sld [smem:[#allocation4 + %s278_s12]]  ;;  %s292_s10 = sadd.s32 2, %s607_s6  ;;  %723 = vset.pattern.permute.xlu0 %v914_v2  ;;  %427 = vmatprep.subr.bf16.mxu0 %v724_v1  ;;  %v729_v7 = vld [vmem:[%s1074_s20 + $0x60] ss:$8 sps:$4 sm:$0xff]   ;;  %v730_v9 = vld [vmem:[%s1074_s20 + $0x54] ss:$8 sps:$4 sm:$0xff]  }
  0x5b   : > { %s293_s24 = sld [smem:[#allocation4 + %s292_s10]]  ;;  %s306_s9 = sadd.s32 3, %s607_s6  ;;  %428 = vmatpush1.bf16.msra.mxu0 %v726_v3  ;;  %v276_v10 = vld [vmem:[%s1154_s3] sm:$0xff]  ;;  %v733_v21 = vld [vmem:[%s1074_s20 + $0x44] ss:$8 sps:$4 sm:$0xff]   ;;  %vm322_vm0 = vcmask 7168  }
  0x5c   : > { %s307_s14 = sld [smem:[#allocation4 + %s306_s9]]  ;;  %429 = vmatprep.subr.bf16.mxu0 %v727_v5  ;;  %v732_v16 = vld [vmem:[%s1074_s20 + $0x50] ss:$8 sps:$4 sm:$0xff]   ;;  %s915_s25 = smov 127   ;;  %v735_v28 = vld [vmem:[%s1074_s20 + $0x40] ss:$8 sps:$4 sm:$0xff]  }
  0x5d   : > { %v736_v30 = vld [vmem:[%s1074_s20 + $0x34] ss:$8 sps:$4 sm:$0xff]   ;;  %s916_s23 = smov 125   ;;  %s917_s29 = smov 126   ;;  %v738_v32 = vld [vmem:[%s1074_s20 + $0x30] ss:$8 sps:$4 sm:$0xff]  }
  0x5e   : > { %v739_v34 = vld [vmem:[%s1074_s20 + $0x24] ss:$8 sps:$4 sm:$0xff]   ;;  %v741_v35 = vld [vmem:[%s1074_s20 + $0x20] ss:$8 sps:$4 sm:$0xff]   ;;  %v742_v36 = vld [vmem:[%s1074_s20 + $0x14] ss:$8 sps:$4 sm:$0xff]  }
  0x5f   : > { %v274_v12 = vstv %s271_s13  ;;  %430 = vmatpush1.bf16.msra.mxu0 %v729_v7  ;;  %v744_v37 = vld [vmem:[%s1074_s20 + $0x10] ss:$8 sps:$4 sm:$0xff]   ;;  %v745_v38 = vld [vmem:[%s1074_s20 + $0x4] ss:$8 sps:$4 sm:$0xff]   ;;  %v747_v39 = vld [vmem:[%s1074_s20] ss:$8 sps:$4 sm:$0xff]  }
  0x60   : > { %v283_v13 = vstv %s279_s26  ;;  %v275_v14 = vmul.f32 %v274_v12, %v273_v6  ;;  %v277_v17 = vmul.f32 %v276_v10, %v274_v12  ;;  %431 = vmatprep.subr.bf16.mxu0 %v730_v9  ;;  %s606_s5 = sshll.u32 %s1070_s11, 4  ;;  %s630_s0 = sshll.u32 %s897_s18, 8 }
  0x61   : > { %v286_v18 = vmul.f32 %v283_v13, %v276_v10  ;;  %v284_v19 = vmul.f32 %v283_v13, %v282_v8  ;;  %v297_v20 = vstv %s293_s24  ;;  %s262_s7 = scalar_lea.vmem [#allocation11], %s606_s5  ;;  %s1109_s13 = scalar_lea.hbm %s1155_s4, %s630_s0 }
  0x62   : > { %v298_v22 = vmul.f32 %v297_v20, %v296_v11  ;;  %v300_v24 = vmul.f32 %v297_v20, %v276_v10  ;;  %v311_v25 = vstv %s307_s14  ;;  %s487_s20 = sshll.u32 %s262_s7, 4  ;;  %s471_s26 = scalar_lea.sflag [#allocation6], %s1070_s11  ;;  %s488_s20 = int_to_ptr.vmem [resolvable:$true] %s487_s20 }
  0x63   : > { %288 = vrot.lane.b32.xlu0 %v286_v18, %s915_s25  ;;  %v285_v23 = vadd.f32 %v284_v19, %v275_v14  ;;  %v314_v26 = vmul.f32 %v311_v25, %v276_v10  ;;  %v312_v27 = vmul.f32 %v311_v25, %v310_v15  ;;  %432 = vmatpush1.bf16.msra.mxu0 %v732_v16  ;;  %s817_s10 = scalar_lea.vmem %s488_s20, 256  ;;  %p1181_p3 = scmp.ne.s32.totalorder %s1169_s27, 0 }
  0x64   : > { %433 = vmatprep.subr.bf16.mxu0 %v733_v21  ;;  %p818_p7 = scmp.ne.s32.totalorder %s488_s20, %s817_s10  ;;  %s918_s18 = smov [#allocation11]  }
  0x65   : > { %v299_v29 = vadd.f32 %v298_v22, %v285_v23  ;;  %316 = vrot.lane.b32.xlu1 %v314_v26, %s916_s23  ;;  %s821_s24 = sshll.u32 %s918_s18, 4  ;;  %s822_s24 = int_to_ptr.vmem [resolvable:$false] %s821_s24 }
  0x66   : > { %p819_p8 = pnand %p818_p7, %p1181_p3  ;;  %s823_s9 = scalar_lea.vmem %s822_s24, 512 }
  0x67   : > { %302 = vrot.lane.b32.xlu0 %v300_v24, %s917_s29  ;;  %v313_v31 = vadd.f32 %v312_v27, %v299_v29  ;;  %434 = vmatpush1.bf16.msra.mxu0 %v735_v28  ;;  %p824_p12 = scmp.lt.s32.totalorder %s488_s20, %s822_s24  ;;  %p825_p13 = scmp.lt.s32.totalorder %s823_s9, %s817_s10 }
  0x68   : > { %435 = vmatprep.subr.bf16.mxu0 %v736_v30  ;;  %p820_p9 = pneg %p819_p8 }
  0x69   : > { %v320_v33 = vpack.c.bf16 %v313_v31, %v313_v31  ;;  %p826_p2 = por %p825_p13, %p824_p12 }
  0x6b   : > { %321 = vst [vmem:[#allocation2] sm:$0xf] %v320_v33  ;;  %436 = vmatpush1.bf16.msra.mxu0 %v738_v32  ;;  %p827_p4 = pnand %p826_p2, %p820_p9 }
  0x6c   : > { %437 = vmatprep.subr.bf16.mxu0 %v739_v34 }
  0x6f   : > { %438 = vmatpush1.bf16.msra.mxu0 %v741_v35 }
  0x70   : > { %439 = vmatprep.subr.bf16.mxu0 %v742_v36 }
  0x72   : > { %v324_v40 = vld [vmem:[#allocation2] sm:$0xf] }
  0x73   : > { %440 = vmatpush1.bf16.msra.mxu0 %v744_v37 }
  0x74   : > { %441 = vmatprep.subr.bf16.mxu0 %v745_v38 }
  0x77   : > { %442 = vmatpush1.bf16.msra.mxu0 %v747_v39 }
  0x7a   : > { %460 = vmatmul.mubr.bf16.vlgmr.msra.gmra.mxu0 %v324_v40 }
  0xd5   : > { %v289_v41 = vpop.permute.xlu0 %288 }
  0xd6   : > { %v291_v42 = vadd.f32 %v289_v41, %v277_v17 }
  0xd7   : > { %v317_v44 = vpop.permute.xlu1 %316 }
  0xd9   : > { %v303_v43 = vpop.permute.xlu0 %302 }
  0xda   : > { %v305_v45 = vadd.f32 %v303_v43, %v291_v42 }
  0xdc   : > { %v319_v46 = vadd.f32 %v317_v44, %v305_v45 }
  0xde   : > { %323 = vst.msk [vmem:[#allocation3] sm:$0xff] %vm322_vm0, %v319_v46 }
  0xe5   : > { %v341_v47 = vld [vmem:[#allocation3] sm:$0xff] }
  0xe6   : > { %344 = vperm.xlu1 %722, %v341_v47  }
 0x13a   : > { %v461_v48 = vpop.f32.mrf.mxu0 }
 0x13c   : > { %v463_v49 = vpop.f32.mrf.mxu0 }
 0x13e   : > { %v465_v50 = vpop.f32.mrf.mxu0 }
 0x140   : > { %v466_v51 = vpop.f32.mrf.mxu0 }
 0x161   : > { %v345_v52 = vpop.permute.xlu1 %344 }
 0x162   : > { %v462_v53 = vadd.f32 %v461_v48, %v345_v52  ;;  %v464_v54 = vadd.f32 %v463_v49, %v345_v52 }
 0x164   : > { %468 = vst [vmem:[%s262_s7] sm:$0xff] %v462_v53  ;;  %469 = vst [vmem:[%s262_s7 + $0x8] sm:$0xff] %v464_v54 }
 0x165   : > { %830 = shalt.err (!%p827_p4)
}
 0x166   : > { %s831_s14 = scalar_lea.hbm %s1109_s13, 256  ;;  %s835_s22 = scalar_lea.hbm %s1155_s4, 512 }
 0x167   : > { %p832_p10 = scmp.ne.s32.totalorder %s1109_s13, %s831_s14  ;;  %p836_p1 = scmp.lt.s32.totalorder %s1109_s13, %s1155_s4 }
 0x168   : > { %p837_p6 = scmp.lt.s32.totalorder %s835_s22, %s831_s14 }
 0x169   : > { %p833_p5 = pnand %p832_p10, %p1181_p3 }
 0x16a   : > { %p838_p11 = por %p837_p6, %p836_p1 }
 0x16b   : > { %p834_p0 = pneg %p833_p5 }
 0x16d   : > { %p839_p7 = pnand %p838_p11, %p834_p0 }
 0x16f   : > { %842 = shalt.err (!%p839_p7)
}
 0x170   : > { %641 = dma.vmem_to_hbm [thread:$0]  (%p1181_p3), %s488_s20, 256, %s1109_s13, %s471_s26  }
 0x171 PF: > { %s1182_s29 = sld [smem:[#allocation16_spill]]  ;;  %s499_s5 = sand.u32 1, %s885_s15  }
 0x172   : > { %p1183_p8 = scmp.ne.s32.totalorder %s1170_s28, 0  ;;  %s500_s0 = scalar_lea.sflag [#allocation6], %s499_s5 }
 0x177   : > { %p1184_p9 = scmp.ge.s32.totalorder %s1182_s29, 2 }
 0x179   : > { %p655_p12 = pnand %p1184_p9, %p1183_p8 }
 0x17b   : > { %p656_p13 = pneg %p655_p12 }
 0x17d   : > { %880 = dma.done.wait (%p656_p13), %s500_s0, 256  }
 0x17e   : > { %882 = vsyncadd (%p656_p13), %s500_s0, 4294967040  ;;  %s22_s20 = sadd.s32 1, %s1182_s29   ;;  %s1185_s15 = smov %s889_s16 }
 0x17f   : > { %p19_p2 = scmp.ge.s32.totalorder %s22_s20, 4   ;;  %s1186_s16 = smov %s893_s17 }
 0x180   : > { %s1187_s17 = smov %s1061_s8  ;;  %s1188_s18 = smov %s901_s19 }
 0x181   : > { %s1189_s19 = smov %s1191_s30  ;;  %21 = sbr.rel (!%p19_p2) target bundleno = 10 (0xa), region = 97 }
 0x186   :  { %505 = vsyncpa [#allocation5], 1 }
 0x187   :  { %507 = vsyncpa [#allocation5 + $0x1], 1 }
 0x188   :  { %508 = vsyncpa [#allocation10], 1 }
 0x189   :  { %509 = vsyncpa [#allocation6], 1 }
 0x18a   :  { %511 = vsyncpa [#allocation6 + $0x1], 1 }
 0x18b   :  { %512 = vsyncpa [#allocation7], 1 }
 0x18c   :  { %514 = vsyncpa [#allocation7 + $0x1], 1 }

</bundles_post_ra>
